<compile_context>
chip_gen: v7x
topology: tpu7x:2x2x1
jax: 0.10.0
libtpu: 0.0.40
codegen_flags: <defaults>
</compile_context>

<pallas_src>
import functools

import jax
import jax.numpy as jnp
from jax.experimental import pallas as pl
from jax.experimental.pallas import tpu as pltpu


def _round_up(x, m):
    return ((x + m - 1) // m) * m


def _default_core_splits():
    """2 splits on dual-TensorCore chips (v7x), 1 otherwise."""
    try:
        kind = jax.devices()[0].device_kind.lower()
    except Exception:  # pragma: no cover - defensive
        return 1
    return 2 if ("v7" in kind or "7x" in kind) else 1


def _mlp_segment_pool_kernel(cat_ref, num_ref, seg_ref,
                             w1c_ref, w1n_ref, b1_ref, w2_ref, b2_ref,
                             sum_ref, *, num_segments_padded):
    """One TN-row tile: 2-layer MLP + masked segment-sum accumulation."""
    t = pl.program_id(1)

    @pl.when(t == 0)
    def _init():
        sum_ref[...] = jnp.zeros_like(sum_ref)

    # Layer 1 on the two bf16 feature streams (replaces a wrapper-side concat):
    #   relu([cat | num] @ W1 + b1) == relu(cat @ W1[:18] + num @ W1[18:] + b1)
    h = jnp.dot(cat_ref[...], w1c_ref[...], preferred_element_type=jnp.float32)
    h = h + jnp.dot(num_ref[...], w1n_ref[...], preferred_element_type=jnp.float32)
    h = jnp.maximum(h + b1_ref[...], 0.0)

    # Layer 2 (+ dropout p=0.0 == identity); bf16 inputs, f32 accumulation.
    h = jnp.dot(h.astype(w2_ref.dtype), w2_ref[...],
                preferred_element_type=jnp.float32)
    h = jnp.maximum(h + b2_ref[...], 0.0)

    # Segment-pooling mask for this tile, built in-kernel from the segment ids.
    # Padded rows carry id = -1 and therefore match no segment (contribute 0).
    seg = seg_ref[0]                                              # (1, TN) int32
    gid = jax.lax.broadcasted_iota(jnp.int32,
                                   (num_segments_padded, seg.shape[-1]), 0)
    mask = (seg == gid).astype(jnp.float32)                       # (G_pad, TN)

    # Per-segment sums accumulate in the VMEM-resident output slab (f32 matmul
    # keeps pooling numerics exact for 0/1 masks).
    sum_ref[...] += jnp.dot(mask, h, preferred_element_type=jnp.float32)[None]


@functools.partial(jax.jit,
                   static_argnames=("num_segments", "tile_rows", "num_core_splits"))
def regression_model_test_forward(features_categorical, features_numerical,
                                  batch, params, *, num_segments,
                                  tile_rows=4096, num_core_splits=None):
    """Pallas forward pass.

    features_categorical: (N, 18) float
    features_numerical:   (N, 3)  float
    batch:                (N,)    int segment ids in [0, num_segments)
    Returns:              (num_segments, 1) float32
    """
    w1, b1, w2, b2, w3, b3 = params
    n, cat_dim = features_categorical.shape
    num_dim = features_numerical.shape[1]
    hidden = w1.shape[1]

    if num_core_splits is None:
        num_core_splits = _default_core_splits()

    # Pad the segment axis of the accumulator slab to a multiple of 8.
    g_pad = _round_up(max(num_segments, 1), 8)

    # --- Tiling: split rows across core-splits, then across TN-row tiles. ----
    rows_per_split = -(-n // num_core_splits)
    tn = min(tile_rows, rows_per_split)
    # Keep the in-kernel (G_pad, TN) f32 mask under ~4 MiB for large G.
    tn = min(tn, max(16, (4 << 20) // (4 * g_pad)))
    tn = _round_up(max(tn, 16), 16)          # bf16 sublane packing
    if tn >= 128:
        tn = _round_up(tn, 128)              # MXU M-dim alignment
    tiles_per_split = -(-rows_per_split // tn)
    padded_n = num_core_splits * tiles_per_split * tn
    total_tiles = num_core_splits * tiles_per_split
    pad = padded_n - n

    # Zero-width pads are no-ops; padded rows are masked out via seg id = -1.
    cat = jnp.pad(features_categorical.astype(jnp.bfloat16), ((0, pad), (0, 0)))
    numf = jnp.pad(features_numerical.astype(jnp.bfloat16), ((0, pad), (0, 0)))
    seg = jnp.pad(batch.astype(jnp.int32), (0, pad), constant_values=-1)
    seg = seg.reshape(total_tiles, 1, tn)

    # Split W1 (in_features, out_features layout) so the kernel never concats;
    # weights go in as bf16 (tiny anyway), biases stay f32.
    w1_cat = w1[:cat_dim].astype(jnp.bfloat16)
    w1_num = w1[cat_dim:].astype(jnp.bfloat16)
    w2_b = w2.astype(jnp.bfloat16)
    b1_f = b1.astype(jnp.float32)
    b2_f = b2.astype(jnp.float32)

    row_map = lambda c, t, tps=tiles_per_split: (c * tps + t, 0)
    seg_map = lambda c, t, tps=tiles_per_split: (c * tps + t, 0, 0)
    rep_map = lambda c, t: (0, 0)

    kernel = functools.partial(_mlp_segment_pool_kernel,
                               num_segments_padded=g_pad)

    sums = pl.pallas_call(
        kernel,
        grid=(num_core_splits, tiles_per_split),
        in_specs=[
            pl.BlockSpec((tn, cat_dim), row_map),          # categorical rows
            pl.BlockSpec((tn, num_dim), row_map),          # numerical rows
            pl.BlockSpec((1, 1, tn), seg_map),             # segment ids
            pl.BlockSpec((cat_dim, hidden), rep_map),      # W1[:cat_dim]
            pl.BlockSpec((num_dim, hidden), rep_map),      # W1[cat_dim:]
            pl.BlockSpec((1, hidden), rep_map),            # b1
            pl.BlockSpec((hidden, hidden), rep_map),       # W2
            pl.BlockSpec((1, hidden), rep_map),            # b2
        ],
        out_specs=pl.BlockSpec((1, g_pad, hidden), lambda c, t: (c, 0, 0)),
        out_shape=jax.ShapeDtypeStruct((num_core_splits, g_pad, hidden),
                                       jnp.float32),
        compiler_params=pltpu.CompilerParams(
            dimension_semantics=("parallel", "arbitrary"),
            vmem_limit_bytes=32 * 1024 * 1024),
    )(cat, numf, seg, w1_cat, w1_num, b1_f, w2_b, b2_f)

    # Tiny finalize in the wrapper: combine per-core partials, divide by counts
    # (counts depend only on `batch`, computed here — no in-kernel cross-lane
    # reduce / lane-width-1 output slab), and apply the degenerate 32->1 head.
    seg_sum = jnp.sum(sums, axis=0)[:num_segments]                 # (G, H)
    seg_cnt = jax.ops.segment_sum(jnp.ones((n, 1), jnp.float32),
                                  batch.astype(jnp.int32),
                                  num_segments=num_segments)       # (G, 1)
    pooled = seg_sum / jnp.maximum(seg_cnt, 1.0)
    return pooled @ w3 + b3                                        # (G, 1)


def init_params(key, input_dim=21, hidden_dim=32):
    """Deterministic PyTorch-Linear-style init (uniform +/- 1/sqrt(fan_in))."""
    ks = jax.random.split(key, 6)

    def lin(kw, kb, fan_in, fan_out):
        bound = 1.0 / jnp.sqrt(fan_in)
        w = jax.random.uniform(kw, (fan_in, fan_out), jnp.float32, -bound, bound)
        b = jax.random.uniform(kb, (1, fan_out), jnp.float32, -bound, bound)
        return w, b

    w1, b1 = lin(ks[0], ks[1], input_dim, hidden_dim)
    w2, b2 = lin(ks[2], ks[3], hidden_dim, hidden_dim)
    w3, b3 = lin(ks[4], ks[5], hidden_dim, 1)
    return (w1, b1, w2, b2, w3, b3)


def _reference_forward(features_categorical, features_numerical, batch, params,
                       num_segments):
    """Pure-JAX f32 reference for correctness check."""
    w1, b1, w2, b2, w3, b3 = params
    x = jnp.concatenate([features_categorical, features_numerical], axis=-1)
    h = jnp.maximum(x @ w1 + b1, 0.0)
    h = jnp.maximum(h @ w2 + b2, 0.0)
    sums = jax.ops.segment_sum(h, batch, num_segments=num_segments)
    cnts = jax.ops.segment_sum(jnp.ones((x.shape[0], 1), jnp.float32), batch,
                               num_segments=num_segments)
    pooled = sums / jnp.maximum(cnts, 1.0)
    return pooled @ w3 + b3


if __name__ == "__main__":
    key = jax.random.PRNGKey(0)
    k_cat, k_num, k_param = jax.random.split(key, 3)

    N = 64                # number of rows (e.g. graph nodes)
    CAT, NUM = 18, 3      # categorical / numerical feature dims
    G = 5                 # number of segments in `batch`
    H = 32                # hidden dim

    features_categorical = jax.random.normal(k_cat, (N, CAT), jnp.float32)
    features_numerical = jax.random.normal(k_num, (N, NUM), jnp.float32)
    batch = jnp.sort(jnp.arange(N, dtype=jnp.int32) % G)   # sorted segment ids

    params = init_params(k_param, input_dim=CAT + NUM, hidden_dim=H)
    ref = _reference_forward(features_categorical, features_numerical, batch,
                             params, G)

    # Small tile_rows to exercise the (core_split, row_tile) grid and the
    # in-kernel accumulation across multiple tiles per split.
    out_small = regression_model_test_forward(
        features_categorical, features_numerical, batch, params,
        num_segments=G, tile_rows=16, num_core_splits=2)
    out_small = jax.block_until_ready(out_small)
    assert out_small.shape == (G, 1), out_small.shape
    assert jnp.allclose(out_small, ref, atol=2e-2, rtol=2e-2), (out_small, ref)

    # Default (large-tile, auto core-split) configuration.
    out = regression_model_test_forward(
        features_categorical, features_numerical, batch, params,
        num_segments=G)
    out = jax.block_until_ready(out)
    assert out.shape == (G, 1), out.shape
    assert jnp.allclose(out, ref, atol=2e-2, rtol=2e-2), (out, ref)

    print("KERNEL_OK")
</pallas_src>

<mosaic_0001>
module attributes {stable_mosaic.version = 11 : i64} {
  func.func private @main(%arg0: i32) attributes {dimension_semantics = [#tpu.dimension_semantics<core_parallel>], iteration_bounds = array<i64: 2>, tpu.core_type = #tpu.core_type<sc_scalar_subcore>, window_params = []} {
    return
  }
}

module attributes {stable_mosaic.version = 11 : i64} {
  func.func private @main(%arg0: i32) attributes {dimension_semantics = [#tpu.dimension_semantics<core_parallel>], iteration_bounds = array<i64: 2>, tpu.core_type = #tpu.core_type<sc_scalar_subcore>, window_params = []} {
    return
  }
}

module attributes {stable_mosaic.version = 11 : i64} {
  func.func @_mlp_segment_pool_kernel(%arg0: i32, %arg1: i32, %arg2: memref<16x18xbf16, #tpu.memory_space<vmem>>, %arg3: memref<16x3xbf16, #tpu.memory_space<vmem>>, %arg4: memref<1x1x16xi32, #tpu.memory_space<vmem>>, %arg5: memref<18x32xbf16, #tpu.memory_space<vmem>>, %arg6: memref<3x32xbf16, #tpu.memory_space<vmem>>, %arg7: memref<1x32xf32, #tpu.memory_space<vmem>>, %arg8: memref<32x32xbf16, #tpu.memory_space<vmem>>, %arg9: memref<1x32xf32, #tpu.memory_space<vmem>>, %arg10: memref<1x8x32xf32, #tpu.memory_space<vmem>>) attributes {dimension_semantics = [#tpu.dimension_semantics<parallel>, #tpu.dimension_semantics<arbitrary>], iteration_bounds = array<i64: 2, 2>, scalar_prefetch = 0 : i64, scratch_operands = 0 : i64, tpu.core_type = #tpu.core_type<tc>, window_params = [{transform_indices = @transform_0, window_bounds = array<i64: 16, 18>}, {transform_indices = @transform_1, window_bounds = array<i64: 16, 3>}, {transform_indices = @transform_2, window_bounds = array<i64: 1, 1, 16>}, {pipeline_mode = #tpu.pipeline_mode<synchronous>, transform_indices = @transform_3, window_bounds = array<i64: 18, 32>}, {pipeline_mode = #tpu.pipeline_mode<synchronous>, transform_indices = @transform_4, window_bounds = array<i64: 3, 32>}, {pipeline_mode = #tpu.pipeline_mode<synchronous>, transform_indices = @transform_5, window_bounds = array<i64: 1, 32>}, {pipeline_mode = #tpu.pipeline_mode<synchronous>, transform_indices = @transform_6, window_bounds = array<i64: 32, 32>}, {pipeline_mode = #tpu.pipeline_mode<synchronous>, transform_indices = @transform_7, window_bounds = array<i64: 1, 32>}, {transform_indices = @transform_8, window_bounds = array<i64: 1, 8, 32>}]} {
    %c0_i32 = arith.constant 0 : i32
    %0 = arith.cmpi eq, %arg1, %c0_i32 : i32
    %1 = arith.extui %0 : i1 to i32
    %c0_i32_0 = arith.constant 0 : i32
    %2 = arith.cmpi ne, %1, %c0_i32_0 : i32
    scf.if %2 {
      %cst_28 = arith.constant 0.000000e+00 : f32
      %35 = vector.broadcast %cst_28 : f32 to vector<1x8x32xf32>
      %c0_29 = arith.constant 0 : index
      %c0_30 = arith.constant 0 : index
      %c0_31 = arith.constant 0 : index
      %36 = vector.load %arg10[%c0_29, %c0_30, %c0_31] : memref<1x8x32xf32, #tpu.memory_space<vmem>>, vector<1x8x32xf32>
      tpu.vector_store %arg10[%c0_29, %c0_30, %c0_31], %35 {strides = array<i32>} : memref<1x8x32xf32, #tpu.memory_space<vmem>>, vector<1x8x32xf32>,
    } else {
    }
    %c0 = arith.constant 0 : index
    %c0_1 = arith.constant 0 : index
    %3 = vector.load %arg2[%c0, %c0_1] : memref<16x18xbf16, #tpu.memory_space<vmem>>, vector<16x18xbf16>
    %c0_2 = arith.constant 0 : index
    %c0_3 = arith.constant 0 : index
    %4 = vector.load %arg5[%c0_2, %c0_3] : memref<18x32xbf16, #tpu.memory_space<vmem>>, vector<18x32xbf16>
    %cst = arith.constant dense<0.000000e+00> : vector<16x32xf32>
    %5 = tpu.matmul %3, %4, %cst {dimension_numbers = #tpu.dot_dimension_numbers<[1], [0], [0], [1], [0, 0, 1, 1], [], []>} : vector<16x18xbf16>, vector<18x32xbf16>, vector<16x32xf32> -> vector<16x32xf32>
    %c0_4 = arith.constant 0 : index
    %c0_5 = arith.constant 0 : index
    %6 = vector.load %arg3[%c0_4, %c0_5] : memref<16x3xbf16, #tpu.memory_space<vmem>>, vector<16x3xbf16>
    %c0_6 = arith.constant 0 : index
    %c0_7 = arith.constant 0 : index
    %7 = vector.load %arg6[%c0_6, %c0_7] : memref<3x32xbf16, #tpu.memory_space<vmem>>, vector<3x32xbf16>
    %cst_8 = arith.constant dense<0.000000e+00> : vector<16x32xf32>
    %8 = tpu.matmul %6, %7, %cst_8 {dimension_numbers = #tpu.dot_dimension_numbers<[1], [0], [0], [1], [0, 0, 1, 1], [], []>} : vector<16x3xbf16>, vector<3x32xbf16>, vector<16x32xf32> -> vector<16x32xf32>
    %9 = arith.addf %5, %8 : vector<16x32xf32>
    %c0_9 = arith.constant 0 : index
    %c0_10 = arith.constant 0 : index
    %10 = vector.load %arg7[%c0_9, %c0_10] : memref<1x32xf32, #tpu.memory_space<vmem>>, vector<1x32xf32>
    %11 = vector.broadcast %10 : vector<1x32xf32> to vector<16x32xf32>
    %12 = arith.addf %9, %11 : vector<16x32xf32>
    %cst_11 = arith.constant 0.000000e+00 : f32
    %13 = vector.broadcast %cst_11 : f32 to vector<16x32xf32>
    %14 = arith.maximumf %12, %13 : vector<16x32xf32>
    %15 = arith.truncf %14 : vector<16x32xf32> to vector<16x32xbf16>
    %c0_12 = arith.constant 0 : index
    %c0_13 = arith.constant 0 : index
    %16 = vector.load %arg8[%c0_12, %c0_13] : memref<32x32xbf16, #tpu.memory_space<vmem>>, vector<32x32xbf16>
    %cst_14 = arith.constant dense<0.000000e+00> : vector<16x32xf32>
    %17 = tpu.matmul %15, %16, %cst_14 {dimension_numbers = #tpu.dot_dimension_numbers<[1], [0], [0], [1], [0, 0, 1, 1], [], []>} : vector<16x32xbf16>, vector<32x32xbf16>, vector<16x32xf32> -> vector<16x32xf32>
    %c0_15 = arith.constant 0 : index
    %c0_16 = arith.constant 0 : index
    %18 = vector.load %arg9[%c0_15, %c0_16] : memref<1x32xf32, #tpu.memory_space<vmem>>, vector<1x32xf32>
    %19 = vector.broadcast %18 : vector<1x32xf32> to vector<16x32xf32>
    %20 = arith.addf %17, %19 : vector<16x32xf32>
    %cst_17 = arith.constant 0.000000e+00 : f32
    %21 = vector.broadcast %cst_17 : f32 to vector<16x32xf32>
    %22 = arith.maximumf %20, %21 : vector<16x32xf32>
    %c0_18 = arith.constant 0 : index
    %c0_19 = arith.constant 0 : index
    %c0_20 = arith.constant 0 : index
    %23 = vector.load %arg4[%c0_18, %c0_19, %c0_20] : memref<1x1x16xi32, #tpu.memory_space<vmem>>, vector<1x1x16xi32>
    %24 = vector.shape_cast %23 : vector<1x1x16xi32> to vector<1x16xi32>
    %25 = tpu.iota {dimensions = array<i32: 0>} : vector<8x16xi32>
    %26 = vector.broadcast %24 : vector<1x16xi32> to vector<8x16xi32>
    %27 = arith.cmpi eq, %26, %25 : vector<8x16xi32>
    %28 = arith.extui %27 : vector<8x16xi1> to vector<8x16xi32>
    %29 = arith.sitofp %28 : vector<8x16xi32> to vector<8x16xf32>
    %c0_21 = arith.constant 0 : index
    %c0_22 = arith.constant 0 : index
    %c0_23 = arith.constant 0 : index
    %30 = vector.load %arg10[%c0_21, %c0_22, %c0_23] : memref<1x8x32xf32, #tpu.memory_space<vmem>>, vector<1x8x32xf32>
    %cst_24 = arith.constant dense<0.000000e+00> : vector<8x32xf32>
    %31 = tpu.matmul %29, %22, %cst_24 {dimension_numbers = #tpu.dot_dimension_numbers<[1], [0], [0], [1], [0, 0, 1, 1], [], []>} : vector<8x16xf32>, vector<16x32xf32>, vector<8x32xf32> -> vector<8x32xf32>
    %32 = vector.shape_cast %31 : vector<8x32xf32> to vector<1x8x32xf32>
    %33 = arith.addf %30, %32 : vector<1x8x32xf32>
    %c0_25 = arith.constant 0 : index
    %c0_26 = arith.constant 0 : index
    %c0_27 = arith.constant 0 : index
    %34 = vector.load %arg10[%c0_25, %c0_26, %c0_27] : memref<1x8x32xf32, #tpu.memory_space<vmem>>, vector<1x8x32xf32>
    tpu.vector_store %arg10[%c0_25, %c0_26, %c0_27], %33 {strides = array<i32>} : memref<1x8x32xf32, #tpu.memory_space<vmem>>, vector<1x8x32xf32>,
    return
  }
  func.func @transform_0(%arg0: i32, %arg1: i32) -> (i32, i32) {
    %c2_i32 = arith.constant 2 : i32
    %0 = arith.muli %arg0, %c2_i32 : i32
    %1 = arith.addi %0, %arg1 : i32
    %c0_i32 = arith.constant 0 : i32
    %c0_i32_0 = arith.constant 0 : i32
    return %1, %c0_i32 : i32, i32
  }
  func.func @transform_1(%arg0: i32, %arg1: i32) -> (i32, i32) {
    %c2_i32 = arith.constant 2 : i32
    %0 = arith.muli %arg0, %c2_i32 : i32
    %1 = arith.addi %0, %arg1 : i32
    %c0_i32 = arith.constant 0 : i32
    %c0_i32_0 = arith.constant 0 : i32
    return %1, %c0_i32 : i32, i32
  }
  func.func @transform_2(%arg0: i32, %arg1: i32) -> (i32, i32, i32) {
    %c2_i32 = arith.constant 2 : i32
    %0 = arith.muli %arg0, %c2_i32 : i32
    %1 = arith.addi %0, %arg1 : i32
    %c0_i32 = arith.constant 0 : i32
    %c0_i32_0 = arith.constant 0 : i32
    %c0_i32_1 = arith.constant 0 : i32
    return %1, %c0_i32, %c0_i32_0 : i32, i32, i32
  }
  func.func @transform_3(%arg0: i32, %arg1: i32) -> (i32, i32) {
    %c0_i32 = arith.constant 0 : i32
    %c0_i32_0 = arith.constant 0 : i32
    %c0_i32_1 = arith.constant 0 : i32
    return %c0_i32, %c0_i32_0 : i32, i32
  }
  func.func @transform_4(%arg0: i32, %arg1: i32) -> (i32, i32) {
    %c0_i32 = arith.constant 0 : i32
    %c0_i32_0 = arith.constant 0 : i32
    %c0_i32_1 = arith.constant 0 : i32
    return %c0_i32, %c0_i32_0 : i32, i32
  }
  func.func @transform_5(%arg0: i32, %arg1: i32) -> (i32, i32) {
    %c0_i32 = arith.constant 0 : i32
    %c0_i32_0 = arith.constant 0 : i32
    %c0_i32_1 = arith.constant 0 : i32
    return %c0_i32, %c0_i32_0 : i32, i32
  }
  func.func @transform_6(%arg0: i32, %arg1: i32) -> (i32, i32) {
    %c0_i32 = arith.constant 0 : i32
    %c0_i32_0 = arith.constant 0 : i32
    %c0_i32_1 = arith.constant 0 : i32
    return %c0_i32, %c0_i32_0 : i32, i32
  }
  func.func @transform_7(%arg0: i32, %arg1: i32) -> (i32, i32) {
    %c0_i32 = arith.constant 0 : i32
    %c0_i32_0 = arith.constant 0 : i32
    %c0_i32_1 = arith.constant 0 : i32
    return %c0_i32, %c0_i32_0 : i32, i32
  }
  func.func @transform_8(%arg0: i32, %arg1: i32) -> (i32, i32, i32) {
    %c0_i32 = arith.constant 0 : i32
    %c0_i32_0 = arith.constant 0 : i32
    %c0_i32_1 = arith.constant 0 : i32
    return %arg0, %c0_i32, %c0_i32_0 : i32, i32, i32
  }
}

</mosaic_0001>

<bundles_post_ra>
// kernel: regression_model_test_forward.1
= control target key start
LH: loop header
LB: loop body
LE: loop exit
PB: predicated region body
PF: predicated region fallthrough
CT: control target
= control target key end

     0   :  { %s1004_s27 = smov 0   ;;  %s1006_s28 = smov 0   ;;  %s1118_s0 = inlined_call_operand.vmem [shape: bf16[64,18], index: 0, kind: input, shape index: {}]   ;;  %s1119_s1 = inlined_call_operand.vmem [shape: bf16[64,3], index: 1, kind: input, shape index: {}]   ;;  %s1120_s2 = inlined_call_operand.vmem [shape: s32[4,1,16], index: 2, kind: input, shape index: {}]   ;;  %s1121_s3 = inlined_call_operand.vmem [shape: bf16[18,32], index: 3, kind: input, shape index: {}]   ;;  %s1122_s4 = inlined_call_operand.vmem [shape: bf16[3,32], index: 4, kind: input, shape index: {}]   ;;  %s1123_s5 = inlined_call_operand.vmem [shape: f32[1,32], index: 5, kind: input, shape index: {}]   ;;  %s1124_s6 = inlined_call_operand.vmem [shape: bf16[32,32], index: 6, kind: input, shape index: {}]   ;;  %s1125_s7 = inlined_call_operand.vmem [shape: f32[1,32], index: 7, kind: input, shape index: {}]   ;;  %s1126_s8 = inlined_call_operand.vmem [shape: f32[2,8,32], index: 8, kind: output, shape index: {}]  }
   0x1   :  { %s1008_s29 = smov 0   ;;  %s1010_s30 = smov 0  }
   0x2   :  { %s1012_s9 = smov 0  }
   0x3 LB: > { %s27_s10 = sadd.s32 1, %s944_s29  ;;  %s30_s11 = sadd.s32 1, %s948_s30  ;;  %s952_s9 = sphi %s1012_s9, %s18_s9   ;;  %s948_s30 = sphi %s1010_s30, %s1132_s30   ;;  %s944_s29 = sphi %s1008_s29, %s1131_s29   ;;  %s940_s28 = sphi %s1006_s28, %s1130_s28   ;;  %s936_s27 = sphi %s1004_s27, %s1129_s27  }
   0x4   : > { %p28_p0 = scmp.ge.s32.totalorder %s27_s10, 2  ;;  %p794_p1 = scmp.ge.s32.totalorder %s952_s9, 1 }
   0x5   : > { %p318_p2 = scmp.lt.s32.totalorder %s952_s9, 5 }
   0x6   : > { %s1134_s10 = smov (%p28_p0, %s27_s10), 0  ;;  %s1136_s11 = smov (!%p28_p0, %s30_s11), %s948_s30 }
   0x7   : > { %p319_p3 = pnand %p794_p1, %p318_p2  ;;  %p32_p4 = scmp.ge.s32.totalorder %s1136_s11, 2 }
   0x8   : > { %s795_s12 = sshll.u32 (!%p319_p3), %s940_s28, 1  ;;  %p392_p7 = scmp.lt.s32.totalorder (!%p319_p3), %s940_s28, 1 }
   0x9   : > { %s1138_s11 = smov (%p32_p4, %s1136_s11), 0  ;;  %322 = sbr.rel (%p319_p3) target bundleno = 695 (0x2b7), region = 52 }
   0xa   : > { %1127 = sst [smem:[#allocation2_spill]] %s1138_s11  ;;  %s366_s13 = sadd.s32 (!%p319_p3), %s936_s27, %s795_s12 }
   0xb   : > { %s796_s14 = sshll.u32 (!%p319_p3), %s366_s13, 1  ;;  %p387_p5 = scmp.lt.s32.totalorder (!%p319_p3), %s366_s13, 3 }
   0xc   : > { %p368_p6 = scmp.lt.s32.totalorder (!%p319_p3), %s796_s14, 7  ;;  %p803_p8 = scmp.ne.s32.totalorder (!%p319_p3), %s936_s27, 0 }
  0x10   : > { %s1140_s13 = smov (!%p387_p5, %s366_s13), 3  ;;  %s1142_s14 = smov (!%p368_p6, %s796_s14), 7 }
  0x11   : > { %s389_s17 = scalar_lea.vmem %s1120_s2, %s1140_s13  ;;  %s797_s18 = sshll.u32 %s1142_s14, 2  ;;  %vm401_vm0 = vcmask (!%p803_p8), 261120   ;;  %v954_v0 = vmov (!%p803_p8), 0.0  }
  0x12   : > { %s1046_s21 = scalar_lea.vmem %s1118_s0, %s797_s18  ;;  %s381_s24 = scalar_lea.vmem %s1119_s1, %s797_s18 }
  0x13   : > { %s1144_s28 = smov (!%p392_p7, %s940_s28), 1  ;;  %400 = sbr.rel (%p803_p8) target bundleno = 26 (0x1a), region = 56 }
  0x14   : > { %s802_s25 = sshll.u32 %s1144_s28, 3 }
  0x15   : > { %s1054_s11 = scalar_lea.vmem %s1126_s8, %s802_s25 }
  0x16   : > { %402 = vst.msk [vmem:[%s1054_s11] sm:$0xff] (!%p803_p8), %vm401_vm0, %v954_v0 }
  0x1a PF: > { %v908_v1 = vld [vmem:[%s1121_s3] sm:$0xff]   ;;  %v955_v2 = vmov 0.0   ;;  %vm420_vm1 = vcmask 1040384   ;;  %vm421_vm2 = vcmask 1041408   ;;  %v956_v4 = vmov 65535   ;;  %v913_v13 = vld [vmem:[%s1124_s6 + $0x8] sm:$0xff]  }
  0x1b   : > { %837 = vmatprep.subr.bf16.mxu1 %v955_v2  ;;  %831 = vmatprep.subr.bf16.mxu0 %v955_v2  ;;  %v410_v3 = vld [vmem:[%s1122_s4] sm:$0x3]  ;;  %v422_v5 = vsel %vm420_vm1, 4294967295, %v956_v4  ;;  %vm957_vm3 = vmmov 0   ;;  %vm416_vm4 = vcmask 23552   ;;  %vm482_vm5 = vcmask 146432  }
  0x1c   : > { %838 = vmatpush3.bf16.msra.mxu1 %v908_v1  ;;  %833 = vmatprep.mubr.msk.bf16.mxu0 %vm957_vm3, %v955_v2  ;;  %v909_v6 = vld [vmem:[%s1121_s3 + $0x8] ss:$0 sps:$4 sm:$0x11]   ;;  %v423_v7 = vsel %vm421_vm2, %v422_v5, 0  ;;  %v910_v10 = vld [vmem:[%s381_s24] sm:$0xff]   ;;  %vm565_vm6 = vcmask 261120   ;;  %v613_v32 = vlaneseq }
  0x1d   : > { %839 = vmatprep.subr.bf16.mxu1 %v955_v2  ;;  %841 = vmatprep.mubr.msk.bf16.mxu1 %vm957_vm3, %v955_v2  ;;  %v425_v8 = vand.u32 %v423_v7, %v410_v3  ;;  %v487_v9 = vsel %vm420_vm1, %v909_v6, 0  ;;  %v911_v11 = vld [vmem:[%s1046_s21] sm:$0xff]   ;;  %v958_v30 = vmov 0.0|0.0   ;;  %vm623_vm8 = vcmask 130048  }
  0x1e   : > { %v912_v12 = vld [vmem:[%s1124_s6] sm:$0xff]   ;;  %v614_v37 = vshrl.u32 %v613_v32, 7 }
  0x1f   : > { %832 = vmatpush3.bf16.msra.mxu0 %v425_v8  ;;  %v810_v16 = vld [vmem:[%s1123_s5] ss:$0 sm:$0xff] }
  0x20   : > { %840 = vmatpush3.bf16.msra.mxu1 %v487_v9  ;;  %845 = vmatprep.subr.bf16.mxu0 %v955_v2  ;;  %v811_v31 = vld [vmem:[%s1125_s7] ss:$0 sm:$0xff] }
  0x21   : > { %860 = vmatprep.subr.bf16.mxu1 %v958_v30  ;;  %v815_v40 = vld [vmem:[%s389_s17] ss:$0 sm:$0xff] }
  0x22   : > { %834 = vmatmul.mubr.msk.bf16.vlgmr.msra.gmra.mrb[0].mxu0 %vm416_vm4, %v910_v10  ;;  %vm619_vm7 = vcmp.eq.s32.totalorder %v815_v40, %v614_v37  ;;  %v622_v45 = vld [vmem:[%s1054_s11] sm:$0xff] }
  0x23   : > { %842 = vmatmul.mubr.msk.bf16.vlgmr.msra.gmra.mrb[0].mxu1 %vm482_vm5, %v911_v11  ;;  %849 = vmatprep.mubr.msk.bf16.mxu0 %vm957_vm3, %v955_v2  ;;  %v816_v44 = vsel %vm619_vm7, 1.0, %v955_v2 }
  0x24   : > { %857 = vmatprep.mubr.msk.f32.mxu1 %vm957_vm3, %v955_v2  ;;  %846 = vmatpush3.bf16.msra.mxu0 %v912_v12 }
  0x25   : > { %847 = vmatprep.subr.bf16.mxu0 %v955_v2 }
  0x28   : > { %848 = vmatpush3.bf16.msra.mxu0 %v913_v13 }
  0xf5   : > { %v461_v14 = vpop.f32.mrb[0].mxu0 }
  0xf6   : > { %v523_v15 = vpop.f32.mrb[0].mxu1  ;;  %v835_v17 = vpop.f32.mrb[1].mxu0 }
  0xf7   : > { %v524_v18 = vadd.f32 %v523_v15, %v461_v14  ;;  %v843_v19 = vpop.f32.mrb[1].mxu1  ;;  %v464_v20 = vpop.f32.mrb[2].mxu0 }
  0xf8   : > { %v526_v21 = vpop.f32.mrb[2].mxu1  ;;  %v836_v23 = vpop.f32.mrb[3].mxu0 }
  0xf9   : > { %v537_v22 = vadd.f32 %v810_v16, %v524_v18  ;;  %v527_v24 = vadd.f32 %v526_v21, %v464_v20  ;;  %v844_v25 = vpop.f32.mrb[3].mxu1 }
  0xfb   : > { %v538_v26 = vadd.f32 %v810_v16, %v527_v24  ;;  %v539_v27 = vmax.f32 %v537_v22, 0.0 }
  0xfd   : > { %v540_v28 = vmax.f32 %v538_v26, 0.0 }
  0xff   : > { %v541_v29 = vpack.c.bf16 %v540_v28, %v539_v27 }
 0x101   : > { %850 = vmatmul.mubr.msk.bf16.vlgmr.msra.gmra.mrb[4].mxu0 %vm565_vm6, %v541_v29 }
 0x1d4   : > { %v603_v33 = vpop.f32.mrb[4].mxu0 }
 0x1d5   : > { %v604_v34 = vadd.f32 %v811_v31, %v603_v33  ;;  %v851_v35 = vpop.f32.mrb[5].mxu0 }
 0x1d6   : > { %v606_v36 = vpop.f32.mrb[6].mxu0 }
 0x1d7   : > { %v607_v38 = vadd.f32 %v811_v31, %v606_v36  ;;  %v852_v39 = vpop.f32.mrb[7].mxu0  ;;  %v610_v41 = vmax.f32 %v604_v34, 0.0 }
 0x1d9   : > { %v611_v42 = vmax.f32 %v607_v38, 0.0 }
 0x1db   : > { %v861_v43 = vpack.c.bf16 %v611_v42, %v610_v41 }
 0x1dd   : > { %862 = vmatpush3.bf16.msra.mxu1 %v861_v43 }
 0x1e0   : > { %858 = vmatmul.mubr.msk.f32.vlgmr.msra.gmra.mrb[4].mxu1 %vm623_vm8, %v816_v44 }
 0x2b3   : > { %v693_v46 = vpop.f32.mrb[4].mxu1 }
 0x2b4   : > { %v697_v47 = vadd.f32 %v693_v46, %v622_v45  ;;  %v859_v48 = vpop.f32.mrb[5].mxu1 }
 0x2b6   : > { %698 = vst.msk [vmem:[%s1054_s11] sm:$0xff] %vm565_vm6, %v697_v47 }
 0x2b7 PF: > { %s18_s9 = sadd.s32 1, %s952_s9   ;;  %s1128_s13 = sld [smem:[#allocation2_spill]] }
 0x2b8   : > { %p15_p9 = scmp.ge.s32.totalorder %s18_s9, 6   ;;  %s1129_s27 = smov %s944_s29 }
 0x2b9   : > { %s1130_s28 = smov %s948_s30  ;;  %s1131_s29 = smov %s1134_s10 }
 0x2ba   :  { %17 = sbr.rel (!%p15_p9) target bundleno = 3 (0x3), region = 92 }
 0x2bd   : > { %s1132_s30 = smov %s1128_s13 }

</bundles_post_ra>
